<compile_context>
chip_gen: v6e
topology: v6e:2x2x1
jax: 0.10.0
libtpu: 0.0.40
codegen_flags: <defaults>
</compile_context>

<pallas_src>
import functools

import jax
import jax.numpy as jnp
from jax import lax
from jax.experimental import pallas as pl
from jax.experimental.pallas import tpu as pltpu

GAMMA = 1.5
ALPHA = 0.25
LANES = 128


def _round_up(x, m):
    return ((x + m - 1) // m) * m


def _cdiv(a, b):
    return -(-a // b)


def _device_config():
    """Returns (num_partitions, default_row_tile) for the local TPU generation."""
    try:
        kind = jax.devices()[0].device_kind.lower()
    except Exception:
        kind = ""
    if "v7" in kind or "7x" in kind:
        # 2 TensorCores per chip; 64 MiB physical VMEM per TC -> keep
        # double-buffered inputs at <= 16 MiB (rt=8192 for f32).
        return 2, 8192
    if "v6" in kind or "trillium" in kind:
        return 1, 8192
    # v5e / v5p / v4 / unknown: single partition, conservative tile that fits
    # the 16 MiB scoped-VMEM default (v5e) without overriding it.
    return 1, 4096


def _focal_loss_kernel(pred_ref, true_ref, out_ref, *,
                       gamma, alpha, total_elems, row_tile, sub_rows,
                       apply_mask):
    c = pl.program_id(0)            # partition axis ("parallel")
    i = pl.program_id(1)            # reduction axis ("arbitrary")
    steps = pl.num_programs(1)
    n_inner = row_tile // sub_rows

    @pl.when(i == 0)
    def _():
        out_ref[...] = jnp.zeros_like(out_ref)

    block_idx = c * steps + i               # logical block index (unclamped)
    base_row = block_idx * row_tile

    def make_body(masked):
        def body(j, acc):
            off = pl.multiple_of(j * sub_rows, sub_rows)
            x = pred_ref[pl.ds(off, sub_rows), :].astype(jnp.float32)  # logits
            z = true_ref[pl.ds(off, sub_rows), :].astype(jnp.float32)  # targets

            # Single exp per element, reused for the BCE log-term and sigmoid.
            e = jnp.exp(-jnp.abs(x))                           # EUP
            # BCEWithLogitsLoss(reduction='none'), numerically stable:
            #   max(x,0) - x*z + log1p(exp(-|x|))
            bce = jnp.maximum(x, 0.0) - x * z + jnp.log1p(e)   # EUP (log1p)

            # sigmoid(x) from the same exp: x>=0 -> 1/(1+e), x<0 -> e/(1+e).
            # Approx reciprocal (EUP) + one Newton step (keeps f32 accuracy).
            d = 1.0 + e
            r = pl.reciprocal(d, approx=True)
            r = r * (2.0 - d * r)
            p = jnp.where(x >= 0, r, e * r)

            # m = 1 - p_t = z*(1-p) + (1-z)*p, computed directly (one fma).
            # Clamp guards ulp-level negatives before sqrt.
            m = jnp.maximum(p + z * (1.0 - 2.0 * p), 0.0)
            af = (1.0 - alpha) + (2.0 * alpha - 1.0) * z
            if gamma == 1.5:
                mf = m * jnp.sqrt(m)            # pow(m, 1.5) without log/exp
            elif gamma == 2.0:
                mf = m * m
            elif gamma == 1.0:
                mf = m
            elif gamma == 0.0:
                mf = jnp.ones_like(m)
            else:
                mf = jnp.power(m, gamma)
            loss = bce * af * mf

            if masked:
                # Zero padded / overhanging elements (flat index >= total).
                # jnp.where is a select, so garbage/NaN in the masked lanes
                # does not propagate.
                row_ids = lax.broadcasted_iota(jnp.int32, loss.shape, 0)
                lane_ids = lax.broadcasted_iota(jnp.int32, loss.shape, 1)
                flat = (base_row + off + row_ids) * LANES + lane_ids
                loss = jnp.where(flat < total_elems, loss, 0.0)

            # Fold the (sub_rows, 128) slice into one (8, 128) vreg.
            return acc + loss.reshape(-1, 8, LANES).sum(axis=0)
        return body

    def accumulate(masked):
        return lax.fori_loop(0, n_inner, make_body(masked),
                             jnp.zeros((8, LANES), jnp.float32), unroll=True)

    if apply_mask:
        # Only the block(s) that reach past `total_elems` pay the mask cost.
        block_end = (block_idx + 1) * (row_tile * LANES)

        @pl.when(block_end <= total_elems)
        def _():
            out_ref[...] += accumulate(False)

        @pl.when(block_end > total_elems)
        def _():
            out_ref[...] += accumulate(True)
    else:
        out_ref[...] += accumulate(False)


def focal_loss(pred, true, *, gamma=GAMMA, alpha=ALPHA,
               row_tile=None, num_partitions=None, sub_rows=512):
    """Focal loss (mean reduction) over logits `pred` and targets `true`."""
    # TODO(synk): only the 'mean' reduction (BCEWithLogitsLoss default) is
    # implemented ('sum'/'none' are not), and no custom_vjp/backward kernel is
    # defined — forward pass only.
    assert pred.shape == true.shape
    total = pred.size

    p_default, rt_default = _device_config()
    P = num_partitions if num_partitions is not None else p_default
    row_tile = row_tile if row_tile is not None else rt_default

    # Min sublane multiple per dtype: 8 (32-bit), 16 (16-bit), 32 (8-bit).
    isize_p = jnp.dtype(pred.dtype).itemsize
    isize_t = jnp.dtype(true.dtype).itemsize
    sub_mult = max(8, 32 // max(min(isize_p, isize_t), 1))

    rows = _cdiv(total, LANES)
    # Adaptive row tile: big enough to amortize per-step overhead (~0.35us),
    # small enough not to grossly over-tile tiny inputs.
    rt = max(min(row_tile, _cdiv(rows, P)), sub_mult)
    sub = _round_up(min(sub_rows, rt), sub_mult)
    rt = _round_up(rt, sub)
    steps = _cdiv(rows, P * rt)

    # Only pad flat arrays up to a multiple of 128 lanes (tiny, only when
    # needed).  Row overhang past the array edge is handled by the in-kernel
    # mask, NOT by padding (avoids a full extra HBM copy of both inputs).
    lane_pad = rows * LANES - total
    pred_flat = pred.reshape(-1)
    true_flat = true.reshape(-1)
    if lane_pad:
        pred_flat = jnp.pad(pred_flat, (0, lane_pad))
        true_flat = jnp.pad(true_flat, (0, lane_pad))
    pred2d = pred_flat.reshape(rows, LANES)
    true2d = true_flat.reshape(rows, LANES)

    covered = P * steps * rt * LANES
    apply_mask = covered != total
    last_block = max(_cdiv(rows, rt) - 1, 0)

    def idx_map(c, i):
        # Clamp so blocks fully past the array edge still issue legal DMAs;
        # the in-kernel mask (driven by the *logical* block index) zeroes
        # whatever they read.
        return (jnp.minimum(c * steps + i, last_block), 0)

    kernel = functools.partial(
        _focal_loss_kernel, gamma=gamma, alpha=alpha, total_elems=total,
        row_tile=rt, sub_rows=sub, apply_mask=apply_mask)

    # Double-buffered input blocks; only raise the scoped-VMEM limit when they
    # would not comfortably fit the smallest (16 MiB, v5e) default.  Cap well
    # below v7x's 64 MiB physical VMEM per TC.
    in_bytes = 2 * rt * LANES * (isize_p + isize_t)
    need = in_bytes + (8 << 20)
    vmem_limit = min(max(need, 32 << 20), 48 << 20) if need > (16 << 20) else None

    partials = pl.pallas_call(
        kernel,
        out_shape=jax.ShapeDtypeStruct((P * 8, LANES), jnp.float32),
        grid_spec=pltpu.PrefetchScalarGridSpec(
            num_scalar_prefetch=0,
            grid=(P, steps),
            in_specs=[
                pl.BlockSpec((rt, LANES), idx_map),
                pl.BlockSpec((rt, LANES), idx_map),
            ],
            out_specs=pl.BlockSpec((8, LANES), lambda c, i: (c, 0)),
        ),
        compiler_params=pltpu.CompilerParams(
            dimension_semantics=("parallel", "arbitrary"),
            vmem_limit_bytes=vmem_limit),
    )(pred2d, true2d)

    # reduction == 'mean' (BCEWithLogitsLoss default)
    return jnp.sum(partials) / float(total)


def _focal_loss_ref(pred, true, gamma=GAMMA, alpha=ALPHA):
    x = pred.astype(jnp.float32)
    z = true.astype(jnp.float32)
    bce = jnp.maximum(x, 0.0) - x * z + jnp.log1p(jnp.exp(-jnp.abs(x)))
    p = jax.nn.sigmoid(x)
    p_t = z * p + (1.0 - z) * (1.0 - p)
    af = z * alpha + (1.0 - z) * (1.0 - alpha)
    mf = jnp.power(jnp.maximum(1.0 - p_t, 0.0), gamma)
    return jnp.mean(bce * af * mf)


if __name__ == "__main__":
    key = jax.random.PRNGKey(0)
    k1, k2 = jax.random.split(key)

    # Small NCHW shapes: batch=2, channels=4, spatial=16x16
    shape = (2, 4, 16, 16)
    pred = jax.random.normal(k1, shape, dtype=jnp.float32) * 2.0   # logits
    true = jax.random.bernoulli(k2, p=0.3, shape=shape).astype(jnp.float32)

    out = focal_loss(pred, true)
    out = jax.block_until_ready(out)

    ref = _focal_loss_ref(pred, true)
    assert jnp.allclose(out, ref, rtol=1e-4, atol=1e-6), (out, ref)

    print("KERNEL_OK")
</pallas_src>

<mosaic_0001>
module attributes {stable_mosaic.version = 11 : i64} {
  func.func @_focal_loss_kernel(%arg0: i32, %arg1: i32, %arg2: memref<16x128xf32, #tpu.memory_space<vmem>>, %arg3: memref<16x128xf32, #tpu.memory_space<vmem>>, %arg4: memref<8x128xf32, #tpu.memory_space<vmem>>) attributes {dimension_semantics = [#tpu.dimension_semantics<parallel>, #tpu.dimension_semantics<arbitrary>], iteration_bounds = array<i64: 1, 1>, scalar_prefetch = 0 : i64, scratch_operands = 0 : i64, tpu.core_type = #tpu.core_type<tc>, window_params = [{transform_indices = @transform_0, window_bounds = array<i64: 16, 128>}, {transform_indices = @transform_1, window_bounds = array<i64: 16, 128>}, {transform_indices = @transform_2, window_bounds = array<i64: 8, 128>}]} {
    %c0_i32 = arith.constant 0 : i32
    %0 = arith.cmpi eq, %arg1, %c0_i32 : i32
    %1 = arith.extui %0 : i1 to i32
    %c0_i32_0 = arith.constant 0 : i32
    %2 = arith.cmpi ne, %1, %c0_i32_0 : i32
    scf.if %2 {
      %cst_18 = arith.constant 0.000000e+00 : f32
      %53 = vector.broadcast %cst_18 : f32 to vector<8x128xf32>
      %c0_19 = arith.constant 0 : index
      %c0_20 = arith.constant 0 : index
      %54 = vector.load %arg4[%c0_19, %c0_20] : memref<8x128xf32, #tpu.memory_space<vmem>>, vector<8x128xf32>
      tpu.vector_store %arg4[%c0_19, %c0_20], %53 {strides = array<i32>} : memref<8x128xf32, #tpu.memory_space<vmem>>, vector<8x128xf32>,
    } else {
    }
    %c0 = arith.constant 0 : index
    %c0_1 = arith.constant 0 : index
    %3 = vector.load %arg4[%c0, %c0_1] : memref<8x128xf32, #tpu.memory_space<vmem>>, vector<8x128xf32>
    %cst = arith.constant 0.000000e+00 : f32
    %4 = vector.broadcast %cst : f32 to vector<8x128xf32>
    %c0_i32_2 = arith.constant 0 : i32
    %c16_i32 = arith.constant 16 : i32
    %5 = arith.muli %c0_i32_2, %c16_i32 : i32
    %6 = tpu.assume_multiple %5, 16 : i32
    %7 = arith.index_cast %6 : i32 to index
    %c0_3 = arith.constant 0 : index
    %8 = vector.load %arg2[%7, %c0_3] : memref<16x128xf32, #tpu.memory_space<vmem>>, vector<16x128xf32>
    %9 = arith.index_cast %6 : i32 to index
    %c0_4 = arith.constant 0 : index
    %10 = vector.load %arg3[%9, %c0_4] : memref<16x128xf32, #tpu.memory_space<vmem>>, vector<16x128xf32>
    %11 = math.absf %8 : vector<16x128xf32>
    %cst_5 = arith.constant 0.000000e+00 : f32
    %12 = vector.broadcast %cst_5 : f32 to vector<16x128xf32>
    %13 = arith.subf %12, %11 : vector<16x128xf32>
    %14 = math.exp %13 : vector<16x128xf32>
    %cst_6 = arith.constant 0.000000e+00 : f32
    %15 = vector.broadcast %cst_6 : f32 to vector<16x128xf32>
    %16 = arith.maximumf %8, %15 : vector<16x128xf32>
    %17 = arith.mulf %8, %10 : vector<16x128xf32>
    %18 = arith.subf %16, %17 : vector<16x128xf32>
    %19 = math.log1p %14 : vector<16x128xf32>
    %20 = arith.addf %18, %19 : vector<16x128xf32>
    %cst_7 = arith.constant 1.000000e+00 : f32
    %21 = vector.broadcast %cst_7 : f32 to vector<16x128xf32>
    %22 = arith.addf %21, %14 : vector<16x128xf32>
    %23 = tpu.reciprocal %22 {approx = true} : vector<16x128xf32> -> vector<16x128xf32>
    %24 = arith.mulf %22, %23 : vector<16x128xf32>
    %cst_8 = arith.constant 2.000000e+00 : f32
    %25 = vector.broadcast %cst_8 : f32 to vector<16x128xf32>
    %26 = arith.subf %25, %24 : vector<16x128xf32>
    %27 = arith.mulf %23, %26 : vector<16x128xf32>
    %cst_9 = arith.constant 0.000000e+00 : f32
    %28 = vector.broadcast %cst_9 : f32 to vector<16x128xf32>
    %29 = arith.cmpf oge, %8, %28 : vector<16x128xf32>
    %30 = arith.mulf %14, %27 : vector<16x128xf32>
    %31 = arith.select %29, %27, %30 : vector<16x128xi1>, vector<16x128xf32>
    %cst_10 = arith.constant 2.000000e+00 : f32
    %32 = vector.broadcast %cst_10 : f32 to vector<16x128xf32>
    %33 = arith.mulf %32, %31 : vector<16x128xf32>
    %cst_11 = arith.constant 1.000000e+00 : f32
    %34 = vector.broadcast %cst_11 : f32 to vector<16x128xf32>
    %35 = arith.subf %34, %33 : vector<16x128xf32>
    %36 = arith.mulf %10, %35 : vector<16x128xf32>
    %37 = arith.addf %31, %36 : vector<16x128xf32>
    %cst_12 = arith.constant 0.000000e+00 : f32
    %38 = vector.broadcast %cst_12 : f32 to vector<16x128xf32>
    %39 = arith.maximumf %37, %38 : vector<16x128xf32>
    %cst_13 = arith.constant -5.000000e-01 : f32
    %40 = vector.broadcast %cst_13 : f32 to vector<16x128xf32>
    %41 = arith.mulf %40, %10 : vector<16x128xf32>
    %cst_14 = arith.constant 7.500000e-01 : f32
    %42 = vector.broadcast %cst_14 : f32 to vector<16x128xf32>
    %43 = arith.addf %42, %41 : vector<16x128xf32>
    %44 = math.sqrt %39 : vector<16x128xf32>
    %45 = arith.mulf %39, %44 : vector<16x128xf32>
    %46 = arith.mulf %20, %43 : vector<16x128xf32>
    %47 = arith.mulf %46, %45 : vector<16x128xf32>
    %48 = vector.shape_cast %47 : vector<16x128xf32> to vector<2x8x128xf32>
    %cst_15 = arith.constant dense<0.000000e+00> : vector<8x128xf32>
    %49 = vector.multi_reduction <add>, %48, %cst_15 [0] : vector<2x8x128xf32> to vector<8x128xf32>
    %50 = arith.addf %4, %49 : vector<8x128xf32>
    %c1_i32 = arith.constant 1 : i32
    %51 = arith.addf %3, %50 : vector<8x128xf32>
    %c0_16 = arith.constant 0 : index
    %c0_17 = arith.constant 0 : index
    %52 = vector.load %arg4[%c0_16, %c0_17] : memref<8x128xf32, #tpu.memory_space<vmem>>, vector<8x128xf32>
    tpu.vector_store %arg4[%c0_16, %c0_17], %51 {strides = array<i32>} : memref<8x128xf32, #tpu.memory_space<vmem>>, vector<8x128xf32>,
    return
  }
  func.func @transform_0(%arg0: i32, %arg1: i32) -> (i32, i32) {
    %c1_i32 = arith.constant 1 : i32
    %0 = arith.muli %arg0, %c1_i32 : i32
    %1 = arith.addi %0, %arg1 : i32
    %c0_i32 = arith.constant 0 : i32
    %2 = arith.minsi %1, %c0_i32 : i32
    %c0_i32_0 = arith.constant 0 : i32
    %c0_i32_1 = arith.constant 0 : i32
    return %2, %c0_i32_0 : i32, i32
  }
  func.func @transform_1(%arg0: i32, %arg1: i32) -> (i32, i32) {
    %c1_i32 = arith.constant 1 : i32
    %0 = arith.muli %arg0, %c1_i32 : i32
    %1 = arith.addi %0, %arg1 : i32
    %c0_i32 = arith.constant 0 : i32
    %2 = arith.minsi %1, %c0_i32 : i32
    %c0_i32_0 = arith.constant 0 : i32
    %c0_i32_1 = arith.constant 0 : i32
    return %2, %c0_i32_0 : i32, i32
  }
  func.func @transform_2(%arg0: i32, %arg1: i32) -> (i32, i32) {
    %c0_i32 = arith.constant 0 : i32
    %c0_i32_0 = arith.constant 0 : i32
    return %arg0, %c0_i32 : i32, i32
  }
}

</mosaic_0001>

<bundles_post_ra>
// kernel: tpu_custom_call.1
= control target key start
LH: loop header
LB: loop body
LE: loop exit
PB: predicated region body
PF: predicated region fallthrough
CT: control target
= control target key end

     0   :  { %7 = vsyncpa [#allocation3], 0  ;;  %s307_s0 = inlined_call_operand.hbm [shape: f32[16,128], index: 0, kind: input, shape index: {}]   ;;  %s308_s1 = inlined_call_operand.hbm [shape: f32[16,128], index: 1, kind: input, shape index: {}]   ;;  %s309_s2 = inlined_call_operand.hbm [shape: f32[8,128], index: 2, kind: output, shape index: {}]  }
   0x1   :  { %8 = vsyncpa [#allocation6], 0 }
   0x2   :  { %9 = vsyncpa [#allocation4], 0  ;;  %s266_s9 = smov [#allocation2]  }
   0x3   :  { %s21_s10 = sshll.u32 %s266_s9, 4  ;;  %s22_s10 = int_to_ptr.vmem [resolvable:$true] %s21_s10 }
   0x4   :  { %s208_s11 = scalar_lea.vmem %s22_s10, 256  ;;  %p213_p1 = scmp.lt.s32.totalorder %s22_s10, %s22_s10 }
   0x5   :  { %p209_p0 = scmp.ne.s32.totalorder %s22_s10, %s208_s11  ;;  %p214_p2 = scmp.lt.s32.totalorder %s208_s11, %s208_s11 }
   0x7   :  { %p215_p3 = por %p214_p2, %p213_p1 }
   0x9   :  { %p216_p4 = pnand %p215_p3, %p209_p0 }
   0xb   :  { %219 = shalt.err (!%p216_p4)
}
   0xc   :  { %s267_s12 = smov 128   ;;  %s268_s13 = smov 8  }
   0xd   :  { %27 = dma.hbm_to_vmem [thread:$0]  %s307_s0, 256, %s22_s10, [#allocation3], %s267_s12, %s267_s12, %s268_s13  }
   0xe   :  { %s269_s16 = smov [#allocation5]  }
   0xf   :  { %s39_s17 = sshll.u32 %s269_s16, 4  ;;  %s40_s17 = int_to_ptr.vmem [resolvable:$true] %s39_s17 }
  0x10   :  { %s228_s18 = scalar_lea.vmem %s40_s17, 256  ;;  %p233_p6 = scmp.lt.s32.totalorder %s40_s17, %s40_s17 }
  0x11   :  { %p229_p5 = scmp.ne.s32.totalorder %s40_s17, %s228_s18  ;;  %p234_p7 = scmp.lt.s32.totalorder %s228_s18, %s228_s18 }
  0x13   :  { %p235_p8 = por %p234_p7, %p233_p6 }
  0x15   :  { %p236_p9 = pnand %p235_p8, %p229_p5 }
  0x17   :  { %239 = shalt.err (!%p236_p9)
}
  0x18   :  { %45 = dma.hbm_to_vmem [thread:$0]  %s308_s1, 256, %s40_s17, [#allocation6], %s267_s12, %s267_s12, %s268_s13  }
  0x19   :  { %260 = dma.done.wait [#allocation3], 256  }
  0x1a   :  { %261 = vsyncadd [#allocation3], 4294967040 }
  0x1b   :  { %262 = dma.done.wait [#allocation6], 256  }
  0x1c   :  { %263 = vsyncadd [#allocation6], 4294967040  ;;  %v292_v0 = vld [vmem:[#allocation2] sm:$0xff]  ;;  %v294_v1 = vld [vmem:[#allocation2 + $0x8] sm:$0xff]  ;;  %s270_s0 = smov [#allocation7]  }
  0x1d   :  { %v70_v2 = vand.u32 2147483647, %v292_v0  ;;  %v71_v3 = vand.u32 2147483647, %v294_v1  ;;  %vm114_vm0 = vcmp.ge.f32.partialorder %v292_v0, 0.0  ;;  %vm115_vm1 = vcmp.ge.f32.partialorder %v294_v1, 0.0 }
  0x1e   :  { %v68_v25 = vld [vmem:[#allocation5] sm:$0xff]  ;;  %v69_v27 = vld [vmem:[#allocation5 + $0x8] sm:$0xff]  ;;  %v78_v44 = vmax.f32 %v292_v0, 0.0  ;;  %v79_v46 = vmax.f32 %v294_v1, 0.0  ;;  %s164_s1 = sshll.u32 %s270_s0, 4  ;;  %s165_s1 = int_to_ptr.vmem [resolvable:$true] %s164_s1 }
  0x1f   :  { %v72_v4 = vsub.f32 0.0, %v70_v2  ;;  %v73_v5 = vsub.f32 0.0, %v71_v3  ;;  %v80_v45 = vmul.f32 %v68_v25, %v292_v0  ;;  %v81_v47 = vmul.f32 %v69_v27, %v294_v1  ;;  %s240_s21 = scalar_lea.vmem %s165_s1, 128  ;;  %p245_p11 = scmp.lt.s32.totalorder %s165_s1, %s165_s1 }
  0x20   :  { %v130_v53 = vmul.f32 -0.5, %v68_v25  ;;  %v131_v56 = vmul.f32 -0.5, %v69_v27  ;;  %p241_p10 = scmp.ne.s32.totalorder %s165_s1, %s240_s21  ;;  %p246_p12 = scmp.lt.s32.totalorder %s240_s21, %s240_s21 }
  0x21   :  { %v74_v6 = vmul.f32 1.442695, %v72_v4  ;;  %v76_v7 = vmul.f32 1.442695, %v73_v5  ;;  %v82_v52 = vsub.f32 %v78_v44, %v80_v45  ;;  %v83_v54 = vsub.f32 %v79_v46, %v81_v47 }
  0x22   :  { %v132_v59 = vadd.f32 0.75, %v130_v53  ;;  %v133_v62 = vadd.f32 0.75, %v131_v56  ;;  %p247_p13 = por %p246_p12, %p245_p11 }
  0x23   :  { %184 = vpow2.f32 %v74_v6 }
  0x24   :  { %186 = vpow2.f32 %v76_v7  ;;  %p248_p0 = pnand %p247_p13, %p241_p10 }
  0x30   :  { %v185_v8 = vpop.eup %184 }
  0x31   :  { %v187_v9 = vpop.eup %186  ;;  %v84_v10 = vadd.f32 1.0, %v185_v8  ;;  %v87_v33 = vmul.f32 -0.5, %v185_v8  ;;  %v90_v40 = vand.u32 2147483647, %v185_v8 }
  0x32   :  { %v93_v11 = vadd.f32 1.0, %v187_v9  ;;  %v96_v35 = vmul.f32 -0.5, %v187_v9  ;;  %v99_v43 = vand.u32 2147483647, %v187_v9 }
  0x33   :  { %188 = vrcp.f32 %v84_v10  ;;  %v88_v38 = vadd.f32 1.0, %v87_v33  ;;  %vm91_vm2 = vcmp.lt.f32.partialorder %v90_v40, 0.0004427343 }
  0x34   :  { %190 = vrcp.f32 %v93_v11  ;;  %v97_v41 = vadd.f32 1.0, %v96_v35  ;;  %vm100_vm3 = vcmp.lt.f32.partialorder %v99_v43, 0.0004427343 }
  0x35   :  { %192 = vlog2.f32 %v84_v10  ;;  %v89_v49 = vmul.f32 %v185_v8, %v88_v38 }
  0x36   :  { %194 = vlog2.f32 %v93_v11  ;;  %v98_v51 = vmul.f32 %v187_v9, %v97_v41 }
  0x40   :  { %v189_v12 = vpop.eup %188 }
  0x41   :  { %v191_v13 = vpop.eup %190  ;;  %v108_v14 = vmul.f32 %v189_v12, %v84_v10 }
  0x42   :  { %v109_v15 = vmul.f32 %v191_v13, %v93_v11  ;;  %v193_v39 = vpop.eup %192 }
  0x43   :  { %v110_v16 = vsub.f32 2.0, %v108_v14  ;;  %v195_v42 = vpop.eup %194  ;;  %v86_v48 = vmul.f32 0.6931472, %v193_v39 }
  0x44   :  { %v111_v17 = vsub.f32 2.0, %v109_v15  ;;  %v95_v50 = vmul.f32 0.6931472, %v195_v42 }
  0x45   :  { %v112_v18 = vmul.f32 %v189_v12, %v110_v16  ;;  %v92_v55 = vsel %vm91_vm2, %v89_v49, %v86_v48 }
  0x46   :  { %v113_v19 = vmul.f32 %v191_v13, %v111_v17  ;;  %v101_v57 = vsel %vm100_vm3, %v98_v51, %v95_v50  ;;  %v102_v58 = vadd.f32 %v92_v55, %v82_v52 }
  0x47   :  { %v116_v20 = vmul.f32 %v185_v8, %v112_v18  ;;  %v103_v61 = vadd.f32 %v101_v57, %v83_v54 }
  0x48   :  { %v117_v21 = vmul.f32 %v187_v9, %v113_v19  ;;  %v150_v5 = vmul.f32 %v132_v59, %v102_v58 }
  0x49   :  { %v118_v22 = vsel %vm114_vm0, %v112_v18, %v116_v20  ;;  %v151_v8 = vmul.f32 %v133_v62, %v103_v61 }
  0x4a   :  { %v119_v23 = vsel %vm115_vm1, %v113_v19, %v117_v21  ;;  %v120_v24 = vmul.f32 2.0, %v118_v22 }
  0x4b   :  { %v121_v26 = vmul.f32 2.0, %v119_v23 }
  0x4c   :  { %v122_v28 = vsub.f32 1.0, %v120_v24 }
  0x4d   :  { %v123_v29 = vsub.f32 1.0, %v121_v26 }
  0x4e   :  { %v124_v30 = vmul.f32 %v122_v28, %v68_v25 }
  0x4f   :  { %v125_v31 = vmul.f32 %v123_v29, %v69_v27 }
  0x50   :  { %v126_v32 = vadd.f32 %v124_v30, %v118_v22 }
  0x51   :  { %v127_v34 = vadd.f32 %v125_v31, %v119_v23 }
  0x52   :  { %v128_v36 = vmax.f32 %v126_v32, 0.0 }
  0x53   :  { %v129_v37 = vmax.f32 %v127_v34, 0.0 }
  0x54   :  { %196 = vrsqrt.f32 %v128_v36  ;;  %vm136_vm4 = vcmp.eq.f32.partialorder %v128_v36, inf  ;;  %v139_v63 = vand.u32 2147483648, %v128_v36  ;;  %vm138_vm5 = vcmp.eq.f32.partialorder %v128_v36, 0.0 }
  0x55   :  { %198 = vrsqrt.f32 %v129_v37  ;;  %vm143_vm6 = vcmp.eq.f32.partialorder %v129_v37, inf  ;;  %v146_v2 = vand.u32 2147483648, %v129_v37  ;;  %vm145_vm7 = vcmp.eq.f32.partialorder %v129_v37, 0.0 }
  0x61   :  { %v197_v60 = vpop.eup %196 }
  0x62   :  { %v199_v0 = vpop.eup %198  ;;  %v135_v1 = vmul.f32 %v197_v60, %v128_v36 }
  0x63   :  { %v142_v3 = vmul.f32 %v199_v0, %v129_v37 }
  0x64   :  { %v137_v4 = vsel %vm136_vm4, %v128_v36, %v135_v1 }
  0x65   :  { %v140_v6 = vsel %vm138_vm5, %v139_v63, %v137_v4  ;;  %v144_v7 = vsel %vm143_vm6, %v129_v37, %v142_v3 }
  0x66   :  { %v147_v9 = vsel %vm145_vm7, %v146_v2, %v144_v7  ;;  %v148_v10 = vmul.f32 %v140_v6, %v128_v36 }
  0x67   :  { %v149_v11 = vmul.f32 %v147_v9, %v129_v37 }
  0x68   :  { %v152_v12 = vmul.f32 %v150_v5, %v148_v10 }
  0x69   :  { %v153_v13 = vmul.f32 %v151_v8, %v149_v11 }
  0x6b   :  { %v154_v14 = vadd.f32 %v153_v13, %v152_v12 }
  0x6d   :  { %157 = vst [vmem:[#allocation7] sm:$0xff] %v154_v14 }
  0x6e   :  { %251 = shalt.err (!%p248_p0)
}
  0x6f   :  { %167 = dma.vmem_to_hbm [thread:$0]  %s165_s1, 128, %s309_s2, [#allocation4]  }
  0x70   :  { %264 = dma.done.wait [#allocation4], 128  }
  0x71   :  { %265 = vsyncadd [#allocation4], 4294967168 }
  0x72   :  { %171 = vsyncpa [#allocation3], 1 }
  0x73   :  { %172 = vsyncpa [#allocation6], 1 }
  0x74   :  { %173 = vsyncpa [#allocation4], 1 }

</bundles_post_ra>
